<compile_context>
chip_gen: v7x
topology: tpu7x:2x2x1
jax: 0.10.0
libtpu: 0.0.40
codegen_flags: <defaults>
</compile_context>

<pallas_src>
import jax
import jax.numpy as jnp
import numpy as np
from jax.experimental import pallas as pl
from jax.experimental.pallas import tpu as pltpu

HIDDEN = 256        # hidden width of the module (nn.Linear(., 256))
TB_DEFAULT = 1024   # default max batch tile (safe on v5e's 16 MiB scoped VMEM)


def _round_up(x, m):
    return ((x + m - 1) // m) * m


def mlp_kernel(a_ref, s_ref, w1a_ref, w1s_ref, b1_ref,
               w2_ref, b2_ref, w3_ref, b3_ref, o_ref):
    action_dim = a_ref.shape[1]
    state_dim_in = s_ref.shape[1]

    # ---- Layer 1 on the VPU (tiny K): broadcast-FMA per input column. ----
    # h1[b, :] = b1 + sum_k a[b, k] * W1a[k, :] + sum_k s[b, k] * W1s[k, :]
    acc = a_ref[:, 0:1] * w1a_ref[0:1, :] + b1_ref[...]
    for k in range(1, action_dim):
        acc = acc + a_ref[:, k:k + 1] * w1a_ref[k:k + 1, :]
    for k in range(state_dim_in):
        acc = acc + s_ref[:, k:k + 1] * w1s_ref[k:k + 1, :]
    h1 = jnp.maximum(acc, 0.0)

    # ---- Layers 2/3 on the MXU: bf16 operands, f32 accumulation. ----
    h2 = (jnp.dot(h1.astype(jnp.bfloat16), w2_ref[...],
                  preferred_element_type=jnp.float32) + b2_ref[...])
    h2 = jnp.maximum(h2, 0.0)

    y = (jnp.dot(h2.astype(jnp.bfloat16), w3_ref[...],
                 preferred_element_type=jnp.float32) + b3_ref[...])
    o_ref[...] = y.astype(o_ref.dtype)   # narrow (TB, state_dim) store


def prepare_kernel_params(params, state_dim, action_dim):
    """Convert f32 (in,out)/(1,out) params into the kernel layout.

    W1 is split into action/state parts (kept f32: layer 1 runs on the VPU);
    W2/W3 are cast to bf16 for the MXU.  Done once, off the hot path."""
    w1, b1, w2, b2, w3, b3 = params
    w1a = w1[:action_dim].astype(jnp.float32)    # (action_dim, H)
    w1s = w1[action_dim:].astype(jnp.float32)    # (state_dim, H)
    return (w1a, w1s, b1.astype(jnp.float32),
            w2.astype(jnp.bfloat16), b2.astype(jnp.float32),
            w3.astype(jnp.bfloat16), b3.astype(jnp.float32))


def next_state_pred_pallas(state, action, kparams, *, state_dim,
                           block_rows=TB_DEFAULT):
    """Forward pass of NextStateSinglePredNetwork.

    state:  (B, state_dim)  or (state_dim,)
    action: (B, action_dim) or (action_dim,)
    kparams: output of prepare_kernel_params.
    """
    w1a, w1s, b1, w2, b2, w3, b3 = kparams

    squeeze = state.ndim == 1
    if squeeze:
        state = state[None, :]
        action = action[None, :]
    state = state.astype(jnp.float32)
    action = action.astype(jnp.float32)

    B = state.shape[0]
    action_dim = action.shape[1]
    sdim_in = state.shape[1]

    # --- batch tile selection ---
    # Sanitize the user-supplied tile (multiple of 16 for bf16 sublane tiles),
    # pick an approximately even split of B to bound padding waste, and force
    # >= 2 grid programs for moderate batches so v7x's 2nd TC gets work.
    block_rows = max(16, _round_up(int(block_rows), 16))
    min_tiles = 2 if B >= 256 else 1
    num_tiles = max(pl.cdiv(B, block_rows), min_tiles)
    TB = _round_up(pl.cdiv(B, num_tiles), 16)
    B_pad = _round_up(B, TB)
    if B_pad != B:
        pad = B_pad - B
        state = jnp.pad(state, ((0, pad), (0, 0)))
        action = jnp.pad(action, ((0, pad), (0, 0)))
    grid = (B_pad // TB,)

    flops = 2 * B_pad * ((action_dim + sdim_in) * HIDDEN
                         + HIDDEN * HIDDEN + HIDDEN * state_dim)
    bytes_accessed = (
        int(action.size) * 4 + int(state.size) * 4 + B_pad * state_dim * 4
        + sum(int(np.prod(p.shape)) * int(p.dtype.itemsize) for p in kparams)
    )
    cost = pl.CostEstimate(flops=int(flops), transcendentals=0,
                           bytes_accessed=int(bytes_accessed))

    out = pl.pallas_call(
        mlp_kernel,
        out_shape=jax.ShapeDtypeStruct((B_pad, state_dim), jnp.float32),
        grid=grid,
        in_specs=[
            # Batch-tiled activations (pipelined over the grid).
            pl.BlockSpec((TB, action_dim), lambda i: (i, 0)),
            pl.BlockSpec((TB, sdim_in), lambda i: (i, 0)),
            # Weights/biases: constant index_map -> loaded once, VMEM-resident.
            pl.BlockSpec(w1a.shape, lambda i: (0, 0)),
            pl.BlockSpec(w1s.shape, lambda i: (0, 0)),
            pl.BlockSpec(b1.shape, lambda i: (0, 0)),
            pl.BlockSpec(w2.shape, lambda i: (0, 0)),
            pl.BlockSpec(b2.shape, lambda i: (0, 0)),
            pl.BlockSpec(w3.shape, lambda i: (0, 0)),
            pl.BlockSpec(b3.shape, lambda i: (0, 0)),
        ],
        # Narrow output: last block dim == full array dim (state_dim), so the
        # (8,128) rule is satisfied and no lane padding / wrapper slice needed.
        out_specs=pl.BlockSpec((TB, state_dim), lambda i: (i, 0)),
        compiler_params=pltpu.CompilerParams(
            dimension_semantics=("parallel",)),
        cost_estimate=cost,
    )(action, state, w1a, w1s, b1, w2, b2, w3, b3)

    if B_pad != B:
        out = out[:B]
    if squeeze:
        out = out[0]
    return out


def init_params(key, state_dim, action_dim, hidden=HIDDEN):
    """Deterministic init matching the nn.Linear shapes of the module.

    Weights returned as (in, out) = PyTorch weight.T; biases as (1, out)."""
    def linear(k, fan_in, fan_out):
        kw, kb = jax.random.split(k)
        bound = 1.0 / np.sqrt(fan_in)
        w = jax.random.uniform(kw, (fan_in, fan_out), jnp.float32, -bound, bound)
        b = jax.random.uniform(kb, (1, fan_out), jnp.float32, -bound, bound)
        return w, b

    k1, k2, k3 = jax.random.split(key, 3)
    w1, b1 = linear(k1, state_dim + action_dim, hidden)   # layer1
    w2, b2 = linear(k2, hidden, hidden)                   # layer2
    w3, b3 = linear(k3, hidden, state_dim)                # layer3
    return (w1, b1, w2, b2, w3, b3)


def reference_forward_f32(state, action, params):
    w1, b1, w2, b2, w3, b3 = params
    x = jnp.concatenate([action, state], axis=1)
    h1 = jnp.maximum(x @ w1 + b1, 0.0)
    h2 = jnp.maximum(h1 @ w2 + b2, 0.0)
    return h2 @ w3 + b3


def reference_forward_bf16(state, action, params):
    """Reference that emulates the kernel's bf16-operand / f32-accum layers."""
    w1, b1, w2, b2, w3, b3 = params
    x = jnp.concatenate([action, state], axis=1)
    h1 = jnp.maximum(x @ w1 + b1, 0.0)
    h2 = jnp.dot(h1.astype(jnp.bfloat16), w2.astype(jnp.bfloat16),
                 preferred_element_type=jnp.float32) + b2
    h2 = jnp.maximum(h2, 0.0)
    return jnp.dot(h2.astype(jnp.bfloat16), w3.astype(jnp.bfloat16),
                   preferred_element_type=jnp.float32) + b3


if __name__ == "__main__":
    state_dim, action_dim, batch = 3, 1, 8  # pendulum-like dims

    key = jax.random.PRNGKey(0)
    kp, ks, ka = jax.random.split(key, 3)
    params = init_params(kp, state_dim, action_dim)
    kparams = prepare_kernel_params(params, state_dim, action_dim)

    # --- small batched case (single grid step) ---
    state = jax.random.normal(ks, (batch, state_dim), jnp.float32)
    action = jax.random.normal(ka, (batch, action_dim), jnp.float32)

    out = next_state_pred_pallas(state, action, kparams, state_dim=state_dim)
    out = jax.block_until_ready(out)
    assert out.shape == (batch, state_dim)

    ref_bf16 = reference_forward_bf16(state, action, params)
    ref_f32 = reference_forward_f32(state, action, params)
    np.testing.assert_allclose(np.asarray(out), np.asarray(ref_bf16),
                               rtol=1e-3, atol=1e-3)
    np.testing.assert_allclose(np.asarray(out), np.asarray(ref_f32),
                               rtol=5e-2, atol=5e-2)

    # --- multi-tile case with ragged batch (exercises grid + padding path) ---
    kb1, kb2 = jax.random.split(jax.random.PRNGKey(1))
    state_b = jax.random.normal(kb1, (300, state_dim), jnp.float32)
    action_b = jax.random.normal(kb2, (300, action_dim), jnp.float32)
    out_b = next_state_pred_pallas(state_b, action_b, kparams,
                                   state_dim=state_dim, block_rows=128)
    out_b = jax.block_until_ready(out_b)
    assert out_b.shape == (300, state_dim)
    np.testing.assert_allclose(
        np.asarray(out_b),
        np.asarray(reference_forward_bf16(state_b, action_b, params)),
        rtol=1e-3, atol=1e-3)

    # --- moderate batch: forces >= 2 grid programs (megacore split on v7x) ---
    kc1, kc2 = jax.random.split(jax.random.PRNGKey(2))
    state_c = jax.random.normal(kc1, (512, state_dim), jnp.float32)
    action_c = jax.random.normal(kc2, (512, action_dim), jnp.float32)
    out_c = next_state_pred_pallas(state_c, action_c, kparams,
                                   state_dim=state_dim)
    out_c = jax.block_until_ready(out_c)
    assert out_c.shape == (512, state_dim)
    np.testing.assert_allclose(
        np.asarray(out_c),
        np.asarray(reference_forward_bf16(state_c, action_c, params)),
        rtol=1e-3, atol=1e-3)

    # --- unbatched (1-D) case, matching the module's len(shape)==1 branch ---
    out_1d = next_state_pred_pallas(state[0], action[0], kparams,
                                    state_dim=state_dim)
    out_1d = jax.block_until_ready(out_1d)
    assert out_1d.shape == (state_dim,)
    np.testing.assert_allclose(np.asarray(out_1d), np.asarray(out[0]),
                               rtol=1e-5, atol=1e-5)

    print("KERNEL_OK")
</pallas_src>

<mosaic_0001>
module attributes {stable_mosaic.version = 11 : i64} {
  func.func @mlp_kernel(%arg0: i32, %arg1: memref<16x1xf32, #tpu.memory_space<vmem>>, %arg2: memref<16x3xf32, #tpu.memory_space<vmem>>, %arg3: memref<1x256xf32, #tpu.memory_space<vmem>>, %arg4: memref<3x256xf32, #tpu.memory_space<vmem>>, %arg5: memref<1x256xf32, #tpu.memory_space<vmem>>, %arg6: memref<256x256xbf16, #tpu.memory_space<vmem>>, %arg7: memref<1x256xf32, #tpu.memory_space<vmem>>, %arg8: memref<256x3xbf16, #tpu.memory_space<vmem>>, %arg9: memref<1x3xf32, #tpu.memory_space<vmem>>, %arg10: memref<16x3xf32, #tpu.memory_space<vmem>>) attributes {dimension_semantics = [#tpu.dimension_semantics<parallel>], iteration_bounds = array<i64: 1>, scalar_prefetch = 0 : i64, scratch_operands = 0 : i64, tpu.core_type = #tpu.core_type<tc>, window_params = [{transform_indices = @transform_0, window_bounds = array<i64: 16, 1>}, {transform_indices = @transform_1, window_bounds = array<i64: 16, 3>}, {pipeline_mode = #tpu.pipeline_mode<synchronous>, transform_indices = @transform_2, window_bounds = array<i64: 1, 256>}, {pipeline_mode = #tpu.pipeline_mode<synchronous>, transform_indices = @transform_3, window_bounds = array<i64: 3, 256>}, {pipeline_mode = #tpu.pipeline_mode<synchronous>, transform_indices = @transform_4, window_bounds = array<i64: 1, 256>}, {pipeline_mode = #tpu.pipeline_mode<synchronous>, transform_indices = @transform_5, window_bounds = array<i64: 256, 256>}, {pipeline_mode = #tpu.pipeline_mode<synchronous>, transform_indices = @transform_6, window_bounds = array<i64: 1, 256>}, {pipeline_mode = #tpu.pipeline_mode<synchronous>, transform_indices = @transform_7, window_bounds = array<i64: 256, 3>}, {pipeline_mode = #tpu.pipeline_mode<synchronous>, transform_indices = @transform_8, window_bounds = array<i64: 1, 3>}, {transform_indices = @transform_9, window_bounds = array<i64: 16, 3>}]} {
    %c0 = arith.constant 0 : index
    %c0_0 = arith.constant 0 : index
    %0 = vector.load %arg1[%c0, %c0_0] : memref<16x1xf32, #tpu.memory_space<vmem>>, vector<16x1xf32>
    %c0_1 = arith.constant 0 : index
    %c0_2 = arith.constant 0 : index
    %1 = vector.load %arg3[%c0_1, %c0_2] : memref<1x256xf32, #tpu.memory_space<vmem>>, vector<1x256xf32>
    %2 = vector.broadcast %0 : vector<16x1xf32> to vector<16x256xf32>
    %3 = vector.broadcast %1 : vector<1x256xf32> to vector<16x256xf32>
    %4 = arith.mulf %2, %3 : vector<16x256xf32>
    %c0_3 = arith.constant 0 : index
    %c0_4 = arith.constant 0 : index
    %5 = vector.load %arg5[%c0_3, %c0_4] : memref<1x256xf32, #tpu.memory_space<vmem>>, vector<1x256xf32>
    %6 = vector.broadcast %5 : vector<1x256xf32> to vector<16x256xf32>
    %7 = arith.addf %4, %6 : vector<16x256xf32>
    %c0_5 = arith.constant 0 : index
    %c0_6 = arith.constant 0 : index
    %8 = vector.load %arg2[%c0_5, %c0_6] : memref<16x3xf32, #tpu.memory_space<vmem>>, vector<16x1xf32>
    %c0_7 = arith.constant 0 : index
    %c0_8 = arith.constant 0 : index
    %9 = vector.load %arg4[%c0_7, %c0_8] : memref<3x256xf32, #tpu.memory_space<vmem>>, vector<1x256xf32>
    %10 = vector.broadcast %8 : vector<16x1xf32> to vector<16x256xf32>
    %11 = vector.broadcast %9 : vector<1x256xf32> to vector<16x256xf32>
    %12 = arith.mulf %10, %11 : vector<16x256xf32>
    %13 = arith.addf %7, %12 : vector<16x256xf32>
    %c0_9 = arith.constant 0 : index
    %c1 = arith.constant 1 : index
    %14 = vector.load %arg2[%c0_9, %c1] : memref<16x3xf32, #tpu.memory_space<vmem>>, vector<16x1xf32>
    %c1_10 = arith.constant 1 : index
    %c0_11 = arith.constant 0 : index
    %15 = vector.load %arg4[%c1_10, %c0_11] : memref<3x256xf32, #tpu.memory_space<vmem>>, vector<1x256xf32>
    %16 = vector.broadcast %14 : vector<16x1xf32> to vector<16x256xf32>
    %17 = vector.broadcast %15 : vector<1x256xf32> to vector<16x256xf32>
    %18 = arith.mulf %16, %17 : vector<16x256xf32>
    %19 = arith.addf %13, %18 : vector<16x256xf32>
    %c0_12 = arith.constant 0 : index
    %c2 = arith.constant 2 : index
    %20 = vector.load %arg2[%c0_12, %c2] : memref<16x3xf32, #tpu.memory_space<vmem>>, vector<16x1xf32>
    %c2_13 = arith.constant 2 : index
    %c0_14 = arith.constant 0 : index
    %21 = vector.load %arg4[%c2_13, %c0_14] : memref<3x256xf32, #tpu.memory_space<vmem>>, vector<1x256xf32>
    %22 = vector.broadcast %20 : vector<16x1xf32> to vector<16x256xf32>
    %23 = vector.broadcast %21 : vector<1x256xf32> to vector<16x256xf32>
    %24 = arith.mulf %22, %23 : vector<16x256xf32>
    %25 = arith.addf %19, %24 : vector<16x256xf32>
    %cst = arith.constant 0.000000e+00 : f32
    %26 = vector.broadcast %cst : f32 to vector<16x256xf32>
    %27 = arith.maximumf %25, %26 : vector<16x256xf32>
    %28 = arith.truncf %27 : vector<16x256xf32> to vector<16x256xbf16>
    %c0_15 = arith.constant 0 : index
    %c0_16 = arith.constant 0 : index
    %29 = vector.load %arg6[%c0_15, %c0_16] : memref<256x256xbf16, #tpu.memory_space<vmem>>, vector<256x256xbf16>
    %cst_17 = arith.constant dense<0.000000e+00> : vector<16x256xf32>
    %30 = tpu.matmul %28, %29, %cst_17 {dimension_numbers = #tpu.dot_dimension_numbers<[1], [0], [0], [1], [0, 0, 1, 1], [], []>} : vector<16x256xbf16>, vector<256x256xbf16>, vector<16x256xf32> -> vector<16x256xf32>
    %c0_18 = arith.constant 0 : index
    %c0_19 = arith.constant 0 : index
    %31 = vector.load %arg7[%c0_18, %c0_19] : memref<1x256xf32, #tpu.memory_space<vmem>>, vector<1x256xf32>
    %32 = vector.broadcast %31 : vector<1x256xf32> to vector<16x256xf32>
    %33 = arith.addf %30, %32 : vector<16x256xf32>
    %cst_20 = arith.constant 0.000000e+00 : f32
    %34 = vector.broadcast %cst_20 : f32 to vector<16x256xf32>
    %35 = arith.maximumf %33, %34 : vector<16x256xf32>
    %36 = arith.truncf %35 : vector<16x256xf32> to vector<16x256xbf16>
    %c0_21 = arith.constant 0 : index
    %c0_22 = arith.constant 0 : index
    %37 = vector.load %arg8[%c0_21, %c0_22] : memref<256x3xbf16, #tpu.memory_space<vmem>>, vector<256x3xbf16>
    %cst_23 = arith.constant dense<0.000000e+00> : vector<16x3xf32>
    %38 = tpu.matmul %36, %37, %cst_23 {dimension_numbers = #tpu.dot_dimension_numbers<[1], [0], [0], [1], [0, 0, 1, 1], [], []>} : vector<16x256xbf16>, vector<256x3xbf16>, vector<16x3xf32> -> vector<16x3xf32>
    %c0_24 = arith.constant 0 : index
    %c0_25 = arith.constant 0 : index
    %39 = vector.load %arg9[%c0_24, %c0_25] : memref<1x3xf32, #tpu.memory_space<vmem>>, vector<1x3xf32>
    %40 = vector.broadcast %39 : vector<1x3xf32> to vector<16x3xf32>
    %41 = arith.addf %38, %40 : vector<16x3xf32>
    %c0_26 = arith.constant 0 : index
    %c0_27 = arith.constant 0 : index
    %42 = vector.load %arg10[%c0_26, %c0_27] : memref<16x3xf32, #tpu.memory_space<vmem>>, vector<16x3xf32>
    tpu.vector_store %arg10[%c0_26, %c0_27], %41 {strides = array<i32>} : memref<16x3xf32, #tpu.memory_space<vmem>>, vector<16x3xf32>,
    return
  }
  func.func @transform_0(%arg0: i32) -> (i32, i32) {
    %c0_i32 = arith.constant 0 : i32
    %c0_i32_0 = arith.constant 0 : i32
    return %arg0, %c0_i32 : i32, i32
  }
  func.func @transform_1(%arg0: i32) -> (i32, i32) {
    %c0_i32 = arith.constant 0 : i32
    %c0_i32_0 = arith.constant 0 : i32
    return %arg0, %c0_i32 : i32, i32
  }
  func.func @transform_2(%arg0: i32) -> (i32, i32) {
    %c0_i32 = arith.constant 0 : i32
    %c0_i32_0 = arith.constant 0 : i32
    %c0_i32_1 = arith.constant 0 : i32
    return %c0_i32, %c0_i32_0 : i32, i32
  }
  func.func @transform_3(%arg0: i32) -> (i32, i32) {
    %c0_i32 = arith.constant 0 : i32
    %c0_i32_0 = arith.constant 0 : i32
    %c0_i32_1 = arith.constant 0 : i32
    return %c0_i32, %c0_i32_0 : i32, i32
  }
  func.func @transform_4(%arg0: i32) -> (i32, i32) {
    %c0_i32 = arith.constant 0 : i32
    %c0_i32_0 = arith.constant 0 : i32
    %c0_i32_1 = arith.constant 0 : i32
    return %c0_i32, %c0_i32_0 : i32, i32
  }
  func.func @transform_5(%arg0: i32) -> (i32, i32) {
    %c0_i32 = arith.constant 0 : i32
    %c0_i32_0 = arith.constant 0 : i32
    %c0_i32_1 = arith.constant 0 : i32
    return %c0_i32, %c0_i32_0 : i32, i32
  }
  func.func @transform_6(%arg0: i32) -> (i32, i32) {
    %c0_i32 = arith.constant 0 : i32
    %c0_i32_0 = arith.constant 0 : i32
    %c0_i32_1 = arith.constant 0 : i32
    return %c0_i32, %c0_i32_0 : i32, i32
  }
  func.func @transform_7(%arg0: i32) -> (i32, i32) {
    %c0_i32 = arith.constant 0 : i32
    %c0_i32_0 = arith.constant 0 : i32
    %c0_i32_1 = arith.constant 0 : i32
    return %c0_i32, %c0_i32_0 : i32, i32
  }
  func.func @transform_8(%arg0: i32) -> (i32, i32) {
    %c0_i32 = arith.constant 0 : i32
    %c0_i32_0 = arith.constant 0 : i32
    %c0_i32_1 = arith.constant 0 : i32
    return %c0_i32, %c0_i32_0 : i32, i32
  }
  func.func @transform_9(%arg0: i32) -> (i32, i32) {
    %c0_i32 = arith.constant 0 : i32
    %c0_i32_0 = arith.constant 0 : i32
    return %arg0, %c0_i32 : i32, i32
  }
}

</mosaic_0001>

<bundles_post_ra>
// kernel: tpu_custom_call.1
= control target key start
LH: loop header
LB: loop body
LE: loop exit
PB: predicated region body
PF: predicated region fallthrough
CT: control target
= control target key end

     0   :  { %14 = vsyncpa [#allocation3], 0  ;;  %s797_s30 = smov [#allocation2]   ;;  %s968_s0 = inlined_call_operand.vmem [shape: f32[16,1], index: 0, kind: input, shape index: {}]   ;;  %s969_s1 = inlined_call_operand.vmem [shape: f32[16,3], index: 1, kind: input, shape index: {}]   ;;  %s970_s2 = inlined_call_operand.vmem [shape: f32[1,256], index: 2, kind: input, shape index: {}]   ;;  %s971_s3 = inlined_call_operand.vmem [shape: f32[3,256], index: 3, kind: input, shape index: {}]   ;;  %s972_s4 = inlined_call_operand.vmem [shape: f32[1,256], index: 4, kind: input, shape index: {}]   ;;  %s973_s5 = inlined_call_operand.hbm [shape: bf16[256,256], index: 5, kind: input, shape index: {}]   ;;  %s974_s6 = inlined_call_operand.vmem [shape: f32[1,256], index: 6, kind: input, shape index: {}]   ;;  %s975_s7 = inlined_call_operand.vmem [shape: bf16[256,3], index: 7, kind: input, shape index: {}]   ;;  %s976_s8 = inlined_call_operand.vmem [shape: f32[1,3], index: 8, kind: input, shape index: {}]   ;;  %s977_s9 = inlined_call_operand.vmem [shape: f32[16,3], index: 9, kind: output, shape index: {}]  }
   0x1   :  { %s30_s10 = sshll.u32 %s797_s30, 4  ;;  %s773_s13 = scalar_lea.hbm %s973_s5, 4096  ;;  %s31_s10 = int_to_ptr.vmem [resolvable:$true] %s30_s10 }
   0x2   :  { %p774_p0 = scmp.ne.s32.totalorder %s973_s5, %s773_s13  ;;  %p777_p1 = scmp.lt.u32.totalorder %s773_s13, %s973_s5 }
   0x4   :  { %p779_p2 = pnand %p777_p1, %p774_p0 }
   0x6   :  { %782 = shalt.err (!%p779_p2)
}
   0x7   :  { %s783_s18 = scalar_lea.vmem %s31_s10, 4096  ;;  %p788_p4 = scmp.lt.s32.totalorder %s31_s10, %s31_s10 }
   0x8   :  { %p784_p3 = scmp.ne.s32.totalorder %s31_s10, %s783_s18  ;;  %p789_p5 = scmp.lt.s32.totalorder %s783_s18, %s783_s18 }
   0xa   :  { %p790_p6 = por %p789_p5, %p788_p4 }
   0xc   :  { %p791_p7 = pnand %p790_p6, %p784_p3 }
   0xe   :  { %794 = shalt.err (!%p791_p7)
}
   0xf   :  { %s798_s19 = smov 128   ;;  %s799_s20 = smov 8  }
  0x10   :  { %36 = dma.hbm_to_vmem [thread:$0]  %s973_s5, 4096, %s31_s10, [#allocation3], %s798_s19, %s798_s19, %s799_s20  }
  0x11   :  { %795 = dma.done.wait [#allocation3], 4096  }
  0x12   :  { %796 = vsyncadd [#allocation3], 4294963200  ;;  %v800_v0 = vmov 0   ;;  %v91_v1 = vld [vmem:[%s969_s1] sm:$0xff]  ;;  %v92_v3 = vld [vmem:[%s969_s1 + $0x8] sm:$0xff]  ;;  %v801_v10 = vmov 1   ;;  %v61_v50 = vlaneseq }
  0x13   :  { %704 = vset.pattern.permute.xlu1 %v800_v0  ;;  %703 = vset.pattern.permute.xlu0 %v800_v0  ;;  %v47_v2 = vld [vmem:[%s968_s0] sm:$0xff]  ;;  %v48_v4 = vld [vmem:[%s968_s0 + $0x8] sm:$0xff]  ;;  %v709_v5 = vld [vmem:[#allocation2 + $0x4] ss:$8 sps:$4 sm:$0xff]   ;;  %v802_v13 = vmov 2   ;;  %vm616_vm0 = vcmask 23552  }
  0x14   :  { %96 = vperm.xlu1 %704, %v91_v1   ;;  %52 = vperm.xlu0 %703, %v47_v2   ;;  %v711_v6 = vld [vmem:[#allocation2] ss:$8 sps:$4 sm:$0xff]   ;;  %v712_v7 = vld [vmem:[#allocation2 + $0x14] ss:$8 sps:$4 sm:$0xff]   ;;  %v714_v8 = vld [vmem:[#allocation2 + $0x10] ss:$8 sps:$4 sm:$0xff]  }
  0x15   :  { %391 = vmatprep.subr.bf16.mxu0 %v709_v5  ;;  %v715_v9 = vld [vmem:[#allocation2 + $0x24] ss:$8 sps:$4 sm:$0xff]   ;;  %v717_v11 = vld [vmem:[#allocation2 + $0x20] ss:$8 sps:$4 sm:$0xff]   ;;  %v718_v12 = vld [vmem:[#allocation2 + $0x34] ss:$8 sps:$4 sm:$0xff]  }
  0x16   :  { %392 = vmatpush1.bf16.msra.mxu0 %v711_v6  ;;  %v720_v14 = vld [vmem:[#allocation2 + $0x30] ss:$8 sps:$4 sm:$0xff]   ;;  %v721_v15 = vld [vmem:[#allocation2 + $0x44] ss:$8 sps:$4 sm:$0xff]   ;;  %v723_v16 = vld [vmem:[#allocation2 + $0x40] ss:$8 sps:$4 sm:$0xff]  }
  0x17   :  { %393 = vmatprep.subr.bf16.mxu0 %v712_v7  ;;  %v724_v17 = vld [vmem:[#allocation2 + $0x54] ss:$8 sps:$4 sm:$0xff]   ;;  %v726_v18 = vld [vmem:[#allocation2 + $0x50] ss:$8 sps:$4 sm:$0xff]   ;;  %v727_v19 = vld [vmem:[#allocation2 + $0x64] ss:$8 sps:$4 sm:$0xff]  }
  0x18   :  { %101 = vperm.xlu1 %704, %v92_v3   ;;  %57 = vperm.xlu0 %703, %v48_v4   ;;  %v757_v20 = vld [vmem:[%s975_s7 + $0x40] sm:$0xff]   ;;  %v729_v21 = vld [vmem:[#allocation2 + $0x60] ss:$8 sps:$4 sm:$0xff]   ;;  %v759_v24 = vld [vmem:[%s975_s7 + $0x48] sm:$0xff]   ;;  %v62_v51 = vshrl.u32 %v61_v50, 7 }
  0x19   :  { %v758_v22 = vld [vmem:[%s975_s7] sm:$0xff]   ;;  %675 = vmatprep.subr.bf16.mxu1 %v757_v20  ;;  %v760_v25 = vld [vmem:[%s975_s7 + $0x8] sm:$0xff]   ;;  %v761_v26 = vld [vmem:[%s975_s7 + $0x50] sm:$0xff]  }
  0x1a   :  { %394 = vmatpush1.bf16.msra.mxu0 %v714_v8  ;;  %v730_v23 = vld [vmem:[#allocation2 + $0x74] ss:$8 sps:$4 sm:$0xff]   ;;  %676 = vmatpush3.bf16.msra.mxu1 %v758_v22  ;;  %v732_v27 = vld [vmem:[#allocation2 + $0x70] ss:$8 sps:$4 sm:$0xff]   ;;  %v733_v28 = vld [vmem:[#allocation2 + $0x84] ss:$8 sps:$4 sm:$0xff]  }
  0x1b   :  { %395 = vmatprep.subr.bf16.mxu0 %v715_v9  ;;  %677 = vmatprep.subr.bf16.mxu1 %v759_v24  ;;  %v762_v29 = vld [vmem:[%s975_s7 + $0x10] sm:$0xff]   ;;  %v763_v30 = vld [vmem:[%s975_s7 + $0x58] sm:$0xff]   ;;  %v736_v32 = vld [vmem:[#allocation2 + $0x94] ss:$8 sps:$4 sm:$0xff]   ;;  %v910_v52 = vsub.s32 0, %v62_v51  ;;  %v912_v53 = vsub.s32 1, %v62_v51 }
  0x1c   :  { %706 = vset.pattern.permute.xlu1 %v801_v10  ;;  %705 = vset.pattern.permute.xlu0 %v801_v10  ;;  %v735_v31 = vld [vmem:[#allocation2 + $0x80] ss:$8 sps:$4 sm:$0xff]   ;;  %v765_v34 = vld [vmem:[%s975_s7 + $0x60] sm:$0xff]   ;;  %v739_v37 = vld [vmem:[#allocation2 + $0xa4] ss:$8 sps:$4 sm:$0xff]  }
  0x1d   :  { %130 = vperm.xlu1 %706, %v92_v3   ;;  %126 = vperm.xlu0 %705, %v91_v1   ;;  %v764_v33 = vld [vmem:[%s975_s7 + $0x18] sm:$0xff]   ;;  %v738_v35 = vld [vmem:[#allocation2 + $0x90] ss:$8 sps:$4 sm:$0xff]   ;;  %v742_v40 = vld [vmem:[#allocation2 + $0xb4] ss:$8 sps:$4 sm:$0xff]  }
  0x1e   :  { %396 = vmatpush1.bf16.msra.mxu0 %v717_v11  ;;  %678 = vmatpush3.bf16.msra.mxu1 %v760_v25  ;;  %v766_v36 = vld [vmem:[%s975_s7 + $0x20] sm:$0xff]   ;;  %v767_v38 = vld [vmem:[%s975_s7 + $0x68] sm:$0xff]   ;;  %v741_v39 = vld [vmem:[#allocation2 + $0xa0] ss:$8 sps:$4 sm:$0xff]  }
  0x1f   :  { %397 = vmatprep.subr.bf16.mxu0 %v718_v12  ;;  %679 = vmatprep.subr.bf16.mxu1 %v761_v26  ;;  %v744_v41 = vld [vmem:[#allocation2 + $0xb0] ss:$8 sps:$4 sm:$0xff]   ;;  %v745_v42 = vld [vmem:[#allocation2 + $0xc4] ss:$8 sps:$4 sm:$0xff]   ;;  %v747_v43 = vld [vmem:[#allocation2 + $0xc0] ss:$8 sps:$4 sm:$0xff]  }
  0x20   :  { %v748_v44 = vld [vmem:[#allocation2 + $0xd4] ss:$8 sps:$4 sm:$0xff]   ;;  %v750_v45 = vld [vmem:[#allocation2 + $0xd0] ss:$8 sps:$4 sm:$0xff]   ;;  %v751_v46 = vld [vmem:[#allocation2 + $0xe4] ss:$8 sps:$4 sm:$0xff]  }
  0x21   :  { %707 = vset.pattern.permute.xlu1 %v802_v13  ;;  %708 = vset.pattern.permute.xlu0 %v802_v13  ;;  %v753_v47 = vld [vmem:[#allocation2 + $0xe0] ss:$8 sps:$4 sm:$0xff]   ;;  %v754_v48 = vld [vmem:[#allocation2 + $0xf4] ss:$8 sps:$4 sm:$0xff]   ;;  %v756_v49 = vld [vmem:[#allocation2 + $0xf0] ss:$8 sps:$4 sm:$0xff]  }
  0x22   :  { %155 = vperm.xlu1 %707, %v91_v1   ;;  %159 = vperm.xlu0 %708, %v92_v3   ;;  %v49_v54 = vld [vmem:[%s970_s2] sm:$0x3]  ;;  %v768_v51 = vld [vmem:[%s975_s7 + $0x28] sm:$0xff]  }
  0x23   :  { %398 = vmatpush1.bf16.msra.mxu0 %v720_v14  ;;  %680 = vmatpush3.bf16.msra.mxu1 %v762_v29  ;;  %v64_v56 = vrot.slane %v49_v54, %v910_v52  ;;  %v68_v57 = vrot.slane %v49_v54, %v912_v53  ;;  %v75_v59 = vld [vmem:[%s972_s4] sm:$0x3]  ;;  %v769_v54 = vld [vmem:[%s975_s7 + $0x70] sm:$0xff]  }
  0x24   :  { %399 = vmatprep.subr.bf16.mxu0 %v721_v15  ;;  %681 = vmatprep.subr.bf16.mxu1 %v763_v30  ;;  %v93_v60 = vld [vmem:[%s971_s3] ss:$4 sm:$0x3]  ;;  %v624_v61 = vld [vmem:[%s971_s3 + $0x1] ss:$4 sm:$0x3]  ;;  %v80_v62 = vrot.slane %v75_v59, %v910_v52  ;;  %v84_v63 = vrot.slane %v75_v59, %v912_v53 }
  0x25   :  { %v108_v4 = vrot.slane %v93_v60, %v910_v52  ;;  %v112_v5 = vrot.slane %v93_v60, %v912_v53  ;;  %v137_v8 = vrot.slane %v624_v61, %v910_v52  ;;  %v141_v9 = vrot.slane %v624_v61, %v912_v53 }
  0x27   :  { %400 = vmatpush1.bf16.msra.mxu0 %v723_v16  ;;  %682 = vmatpush3.bf16.msra.mxu1 %v764_v33  ;;  %v625_v16 = vld [vmem:[%s971_s3 + $0x2] ss:$4 sm:$0x3] }
  0x28   :  { %401 = vmatprep.subr.bf16.mxu0 %v724_v17  ;;  %683 = vmatprep.subr.bf16.mxu1 %v765_v34 }
  0x2b   :  { %402 = vmatpush1.bf16.msra.mxu0 %v726_v18  ;;  %684 = vmatpush3.bf16.msra.mxu1 %v766_v36 }
  0x2c   :  { %403 = vmatprep.subr.bf16.mxu0 %v727_v19  ;;  %685 = vmatprep.subr.bf16.mxu1 %v767_v38 }
  0x2f   :  { %404 = vmatpush1.bf16.msra.mxu0 %v729_v21  ;;  %686 = vmatpush3.bf16.msra.mxu1 %v768_v51 }
  0x30   :  { %405 = vmatprep.subr.bf16.mxu0 %v730_v23  ;;  %687 = vmatprep.subr.bf16.mxu1 %v769_v54 }
  0x33   :  { %406 = vmatpush1.bf16.msra.mxu0 %v732_v27  ;;  %v166_v27 = vrot.slane %v625_v16, %v910_v52 }
  0x34   :  { %407 = vmatprep.subr.bf16.mxu0 %v733_v28  ;;  %v170_v28 = vrot.slane %v625_v16, %v912_v53 }
  0x37   :  { %408 = vmatpush1.bf16.msra.mxu0 %v735_v31 }
  0x38   :  { %409 = vmatprep.subr.bf16.mxu0 %v736_v32 }
  0x3b   :  { %410 = vmatpush1.bf16.msra.mxu0 %v738_v35 }
  0x3c   :  { %411 = vmatprep.subr.bf16.mxu0 %v739_v37 }
  0x3f   :  { %412 = vmatpush1.bf16.msra.mxu0 %v741_v39 }
  0x40   :  { %413 = vmatprep.subr.bf16.mxu0 %v742_v40 }
  0x43   :  { %414 = vmatpush1.bf16.msra.mxu0 %v744_v41 }
  0x44   :  { %415 = vmatprep.subr.bf16.mxu0 %v745_v42 }
  0x47   :  { %416 = vmatpush1.bf16.msra.mxu0 %v747_v43 }
  0x48   :  { %417 = vmatprep.subr.bf16.mxu0 %v748_v44 }
  0x4b   :  { %418 = vmatpush1.bf16.msra.mxu0 %v750_v45 }
  0x4c   :  { %419 = vmatprep.subr.bf16.mxu0 %v751_v46 }
  0x4f   :  { %420 = vmatpush1.bf16.msra.mxu0 %v753_v47 }
  0x50   :  { %421 = vmatprep.subr.bf16.mxu0 %v754_v48 }
  0x53   :  { %422 = vmatpush1.bf16.msra.mxu0 %v756_v49 }
  0x93   :  { %v97_v55 = vpop.permute.xlu1 %96  ;;  %v53_v58 = vpop.permute.xlu0 %52 }
  0x94   :  { %v71_v0 = vmul.f32 %v64_v56, %v53_v58  ;;  %v72_v1 = vmul.f32 %v68_v57, %v53_v58  ;;  %v115_v17 = vmul.f32 %v108_v4, %v97_v55  ;;  %v116_v18 = vmul.f32 %v112_v5, %v97_v55  ;;  %v770_v55 = vld [vmem:[%s975_s7 + $0x30] sm:$0xff]   ;;  %v219_v58 = vld [vmem:[%s974_s6] sm:$0x3] }
  0x95   :  { %688 = vmatpush3.bf16.msra.mxu1 %v770_v55  ;;  %v224_v59 = vrot.slane %v219_v58, %v910_v52  ;;  %v228_v60 = vrot.slane %v219_v58, %v912_v53  ;;  %v658_v52 = vld [vmem:[%s976_s8] ss:$0 sm:$0xff] }
  0x96   :  { %v87_v14 = vadd.f32 %v80_v62, %v71_v0  ;;  %v88_v15 = vadd.f32 %v84_v63, %v72_v1 }
  0x97   :  { %v102_v2 = vpop.permute.xlu1 %101  ;;  %v58_v3 = vpop.permute.xlu0 %57 }
  0x98   :  { %v73_v6 = vmul.f32 %v64_v56, %v58_v3  ;;  %v74_v7 = vmul.f32 %v68_v57, %v58_v3  ;;  %v117_v10 = vmul.f32 %v108_v4, %v102_v2  ;;  %v118_v11 = vmul.f32 %v112_v5, %v102_v2  ;;  %v771_v56 = vld [vmem:[%s975_s7 + $0x78] sm:$0xff]  }
  0x99   :  { %v119_v29 = vadd.f32 %v115_v17, %v87_v14  ;;  %v120_v30 = vadd.f32 %v116_v18, %v88_v15  ;;  %v772_v57 = vld [vmem:[%s975_s7 + $0x38] sm:$0xff]   ;;  %689 = vmatprep.subr.bf16.mxu1 %v771_v56 }
  0x9a   :  { %v89_v12 = vadd.f32 %v80_v62, %v73_v6  ;;  %v90_v13 = vadd.f32 %v84_v63, %v74_v7  ;;  %690 = vmatpush3.bf16.msra.mxu1 %v772_v57 }
  0x9c   :  { %v131_v19 = vpop.permute.xlu1 %130  ;;  %v121_v20 = vadd.f32 %v117_v10, %v89_v12  ;;  %v122_v21 = vadd.f32 %v118_v11, %v90_v13  ;;  %v127_v22 = vpop.permute.xlu0 %126 }
  0x9d   :  { %v146_v23 = vmul.f32 %v137_v8, %v131_v19  ;;  %v147_v24 = vmul.f32 %v141_v9, %v131_v19  ;;  %v144_v25 = vmul.f32 %v137_v8, %v127_v22  ;;  %v145_v26 = vmul.f32 %v141_v9, %v127_v22 }
  0x9f   :  { %v150_v31 = vadd.f32 %v146_v23, %v121_v20  ;;  %v151_v32 = vadd.f32 %v147_v24, %v122_v21  ;;  %v148_v33 = vadd.f32 %v144_v25, %v119_v29  ;;  %v149_v34 = vadd.f32 %v145_v26, %v120_v30 }
  0xa1   :  { %v156_v35 = vpop.permute.xlu1 %155  ;;  %v160_v36 = vpop.permute.xlu0 %159 }
  0xa2   :  { %v173_v37 = vmul.f32 %v166_v27, %v156_v35  ;;  %v174_v38 = vmul.f32 %v170_v28, %v156_v35  ;;  %v175_v39 = vmul.f32 %v166_v27, %v160_v36  ;;  %v176_v40 = vmul.f32 %v170_v28, %v160_v36 }
  0xa4   :  { %v177_v41 = vadd.f32 %v173_v37, %v148_v33  ;;  %v179_v42 = vadd.f32 %v175_v39, %v150_v31  ;;  %v178_v43 = vadd.f32 %v174_v38, %v149_v34  ;;  %v180_v44 = vadd.f32 %v176_v40, %v151_v32 }
  0xa6   :  { %v181_v45 = vmax.f32 %v177_v41, 0.0  ;;  %v183_v46 = vmax.f32 %v179_v42, 0.0  ;;  %v182_v47 = vmax.f32 %v178_v43, 0.0  ;;  %v184_v48 = vmax.f32 %v180_v44, 0.0 }
  0xa8   :  { %v186_v49 = vpack.c.bf16 %v184_v48, %v182_v47  ;;  %v185_v50 = vpack.c.bf16 %v183_v46, %v181_v45 }
  0xaa   :  { %423 = vmatprep.mubr.bf16.mxu0 %v186_v49 }
  0xab   :  { %424 = vmatmul.mubr.bf16.vlgmr.msra.gmra.mrb[0].mxu0 %v185_v50 }
 0x17e   :  { %v425_v61 = vpop.f32.mrb[0].mxu0 }
 0x17f   :  { %v426_v62 = vadd.f32 %v425_v61, %v224_v59  ;;  %v427_v63 = vpop.f32.mrb[1].mxu0 }
 0x180   :  { %v428_v0 = vadd.f32 %v427_v63, %v228_v60  ;;  %v429_v1 = vpop.f32.mrb[2].mxu0 }
 0x181   :  { %v430_v2 = vadd.f32 %v429_v1, %v224_v59  ;;  %v431_v3 = vpop.f32.mrb[3].mxu0  ;;  %v434_v5 = vmax.f32 %v426_v62, 0.0 }
 0x182   :  { %v432_v4 = vadd.f32 %v431_v3, %v228_v60  ;;  %v435_v7 = vmax.f32 %v428_v0, 0.0 }
 0x183   :  { %v436_v6 = vmax.f32 %v430_v2, 0.0 }
 0x184   :  { %v437_v8 = vmax.f32 %v432_v4, 0.0 }
 0x185   :  { %v438_v9 = vpack.c.bf16 %v436_v6, %v434_v5 }
 0x186   :  { %v439_v10 = vpack.c.bf16 %v437_v8, %v435_v7 }
 0x188   :  { %607 = vmatprep.mubr.bf16.mxu1 %v439_v10 }
 0x189   :  { %608 = vmatmul.mubr.bf16.vlgmr.msra.gmra.mrb[0].mxu1 %v438_v9 }
 0x25c   :  { %v691_v11 = vpop.f32.mrb[0].mxu1 }
 0x25d   :  { %v692_v53 = vpop.f32.mrb[1].mxu1 }
 0x25e   :  { %v693_v12 = vadd.f32 %v692_v53, %v691_v11  ;;  %v694_v13 = vpop.f32.mrb[2].mxu1 }
 0x25f   :  { %v695_v14 = vpop.f32.mrb[3].mxu1 }
 0x260   :  { %v610_v15 = vadd.f32 %v693_v12, %v658_v52  ;;  %v696_v16 = vadd.f32 %v695_v14, %v694_v13 }
 0x262   :  { %617 = vst.msk [vmem:[%s977_s9] sm:$0xff] %vm616_vm0, %v610_v15  ;;  %v613_v17 = vadd.f32 %v696_v16, %v658_v52 }
 0x264   :  { %618 = vst.msk [vmem:[%s977_s9 + $0x8] sm:$0xff] %vm616_vm0, %v613_v17 }
 0x265   :  { %623 = vsyncpa [#allocation3], 1 }

</bundles_post_ra>
